<compile_context>
chip_gen: v6e
topology: v6e:2x2x1
jax: 0.10.0
libtpu: 0.0.40
codegen_flags: <defaults>
</compile_context>

<pallas_src>
import functools
import math

import jax
import jax.numpy as jnp
from jax.experimental import pallas as pl
from jax.experimental.pallas import tpu as pltpu


def make_positional_encoding(d_model: int, max_len: int = 5000) -> jnp.ndarray:
    """PE table identical to the PyTorch __init__ (shape (max_len, d_model))."""
    assert d_model % 2 == 0, "classic sin/cos PE (like the torch snippet) needs even d_model"
    position = jnp.arange(0, max_len, dtype=jnp.float32)[:, None]              # (max_len, 1)
    div_term = jnp.exp(
        jnp.arange(0, d_model, 2, dtype=jnp.float32) * (-math.log(10000.0) / d_model)
    )                                                                           # (d_model//2,)
    angles = position * div_term                                                # (max_len, d_model//2)
    pe = jnp.zeros((max_len, d_model), dtype=jnp.float32)
    pe = pe.at[:, 0::2].set(jnp.sin(angles))
    pe = pe.at[:, 1::2].set(jnp.cos(angles))
    return pe


def _round_up(a: int, m: int) -> int:
    return -(-a // m) * m


def _sublane_multiple(itemsize: int) -> int:
    # Second-minor padding of a VMEM tile: 8 for 32-bit, 16 for 16-bit, 32 for 8-bit.
    return max(8, 32 // max(1, itemsize))


def _choose_sublane_fold(b: int, s: int, d: int, itemsize: int) -> int:
    """Pick S8 | S so that folding S8 sequence rows into the batch (sublane) axis
    maximizes (8,128) packing of the (B*S8, (S/S8)*D) blocks."""
    sub = _sublane_multiple(itemsize)
    if b % sub == 0:
        return 1
    full = s * d

    def eff(s8: int) -> float:
        rows = b * s8
        return rows / _round_up(rows, sub)

    best_s8, best_eff = 1, eff(1)
    for s8 in range(2, s + 1):
        if s % s8:
            continue
        if (s // s8) * d < min(128, full):
            break  # keep the lane axis >= 128 lanes when the array allows it
        e = eff(s8)
        if e > best_eff + 1e-9:
            best_s8, best_eff = s8, e
        if best_eff >= 1.0:
            break  # smallest perfect fold found
    return best_s8


def _choose_lane_tile(f2: int, itemsize: int, x_rows: int, pe_rows: int,
                      budget_bytes: int) -> int:
    """Lane-tile TF (multiple of 128, or the full extent) sized so the
    double-buffered, sublane-PADDED x/out/pe VMEM buffers fit `budget_bytes`."""
    if f2 <= 128:
        return f2  # full-extent block; exempt from the 128-lane rule
    sub = _sublane_multiple(itemsize)
    # 2-deep pipelining of x, out and pe buffers, each padded to `sub` sublanes.
    bytes_per_lane = 2 * (2 * _round_up(x_rows, sub) + _round_up(pe_rows, sub)) * itemsize
    tf_cap = max(128, (budget_bytes // bytes_per_lane) // 128 * 128)
    if tf_cap >= f2:
        # Budget allows a single block; still split in two so both v7x cores get work.
        tf = _round_up(pl.cdiv(f2, 2), 128)
    else:
        tf = tf_cap
        n_steps = pl.cdiv(f2, tf)
        if n_steps > 1 and n_steps % 2 == 1:
            cand = _round_up(pl.cdiv(f2, n_steps + 1), 128)
            if cand >= 128 and pl.cdiv(f2, cand) % 2 == 0:
                tf = cand  # even step count -> balanced megacore split
    return tf


def _add_pe_kernel(x_ref, pe_ref, o_ref, *, reps: int):
    # x_ref/o_ref: (rows, TF) tile; pe_ref: (pe_rows, TF) tile.
    pe = pe_ref[...]
    if reps > 1:
        # Batch folded into sublanes: repeat the pe tile `B` times along sublanes.
        pe = jnp.concatenate([pe] * reps, axis=0)
    o_ref[...] = (x_ref[...] + pe).astype(o_ref.dtype)


def positional_encoding_forward(x: jnp.ndarray, pe: jnp.ndarray, *,
                                vmem_budget_bytes: int = 12 * 1024 * 1024) -> jnp.ndarray:
    """x: (B, S, D), pe: (max_len, D).  Returns x + pe[None, :S, :] (dtype of x).

    `vmem_budget_bytes` bounds the total double-buffered VMEM footprint; the
    12 MiB default fits v5e's 16 MiB scoped window, raise to ~24 MiB on v6e/v7x.
    """
    b, s, d = x.shape
    max_len, d_pe = pe.shape
    assert d_pe == d, f"pe d_model {d_pe} != x d_model {d}"
    assert s <= max_len, f"seq_len {s} exceeds PE table max_len {max_len}"
    itemsize = jnp.dtype(x.dtype).itemsize

    # Fold part of S into the sublane axis when B alone packs sublanes poorly.
    s8 = _choose_sublane_fold(b, s, d, itemsize)
    rows = b * s8                 # sublane axis of the kernel blocks
    f2 = (s // s8) * d            # lane-dense flattened axis

    # Glue outside the kernel: static slice, dtype match, lane-dense fold.
    # NOTE: casting pe to x.dtype differs from torch's promotion for sub-f32 x
    # (torch promotes the add to f32); identical for f32 inputs.
    pe2 = pe[:s, :].astype(x.dtype).reshape(s8, f2)
    x2 = x.reshape(rows, f2)

    tf = _choose_lane_tile(f2, itemsize, rows, s8, vmem_budget_bytes)
    grid = (pl.cdiv(f2, tf),)     # masked tail block if tf does not divide f2
    reps = b if s8 > 1 else 1     # s8 == 1 -> (1, TF) pe tile broadcasts over sublanes

    out2 = pl.pallas_call(
        functools.partial(_add_pe_kernel, reps=reps),
        out_shape=jax.ShapeDtypeStruct((rows, f2), x.dtype),
        grid_spec=pltpu.PrefetchScalarGridSpec(
            num_scalar_prefetch=0,
            grid=grid,
            in_specs=[
                pl.BlockSpec((rows, tf), lambda j: (0, j)),   # x: whole (folded) batch, TF lanes
                pl.BlockSpec((s8, tf), lambda j: (0, j)),     # pe: fetched once per lane tile
            ],
            out_specs=pl.BlockSpec((rows, tf), lambda j: (0, j)),
        ),
        compiler_params=pltpu.CompilerParams(
            dimension_semantics=("parallel",),
        ),
        # Output reuses x's buffer when the caller donates x (halves HBM footprint).
        input_output_aliases={0: 0},
    )(x2, pe2)

    return out2.reshape(b, s, d)


if __name__ == "__main__":
    d_model = 32
    max_len = 64
    batch = 2
    seq = 8

    pe = make_positional_encoding(d_model, max_len)

    key = jax.random.PRNGKey(0)
    x = jax.random.normal(key, (batch, seq, d_model), dtype=jnp.float32)

    # Reference computed BEFORE the kernel call because x is donated below.
    ref = x + pe[None, :seq, :].astype(x.dtype)

    fwd = jax.jit(positional_encoding_forward, donate_argnums=0)
    out = jax.block_until_ready(fwd(x, pe))

    assert out.shape == (batch, seq, d_model)
    assert jnp.allclose(out, ref, atol=1e-6), "mismatch vs reference"
    print("KERNEL_OK")
</pallas_src>

<mosaic_0001>
module attributes {stable_mosaic.version = 11 : i64} {
  func.func @_add_pe_kernel(%arg0: i32, %arg1: memref<4x128xf32, #tpu.memory_space<vmem>>, %arg2: memref<2x128xf32, #tpu.memory_space<vmem>>, %arg3: memref<4x128xf32, #tpu.memory_space<vmem>>) attributes {dimension_semantics = [#tpu.dimension_semantics<parallel>], iteration_bounds = array<i64: 1>, scalar_prefetch = 0 : i64, scratch_operands = 0 : i64, tpu.core_type = #tpu.core_type<tc>, window_params = [{transform_indices = @transform_0, window_bounds = array<i64: 4, 128>}, {transform_indices = @transform_1, window_bounds = array<i64: 2, 128>}, {transform_indices = @transform_2, window_bounds = array<i64: 4, 128>}]} {
    %c0 = arith.constant 0 : index
    %c0_0 = arith.constant 0 : index
    %0 = vector.load %arg2[%c0, %c0_0] : memref<2x128xf32, #tpu.memory_space<vmem>>, vector<2x128xf32>
    %1 = tpu.concatenate %0, %0 in 0 : vector<2x128xf32>, vector<2x128xf32> -> vector<4x128xf32>
    %c0_1 = arith.constant 0 : index
    %c0_2 = arith.constant 0 : index
    %2 = vector.load %arg1[%c0_1, %c0_2] : memref<4x128xf32, #tpu.memory_space<vmem>>, vector<4x128xf32>
    %3 = arith.addf %2, %1 : vector<4x128xf32>
    %c0_3 = arith.constant 0 : index
    %c0_4 = arith.constant 0 : index
    %4 = vector.load %arg3[%c0_3, %c0_4] : memref<4x128xf32, #tpu.memory_space<vmem>>, vector<4x128xf32>
    tpu.vector_store %arg3[%c0_3, %c0_4], %3 {strides = array<i32>} : memref<4x128xf32, #tpu.memory_space<vmem>>, vector<4x128xf32>,
    return
  }
  func.func @transform_0(%arg0: i32) -> (i32, i32) {
    %c0_i32 = arith.constant 0 : i32
    %c0_i32_0 = arith.constant 0 : i32
    return %c0_i32, %arg0 : i32, i32
  }
  func.func @transform_1(%arg0: i32) -> (i32, i32) {
    %c0_i32 = arith.constant 0 : i32
    %c0_i32_0 = arith.constant 0 : i32
    return %c0_i32, %arg0 : i32, i32
  }
  func.func @transform_2(%arg0: i32) -> (i32, i32) {
    %c0_i32 = arith.constant 0 : i32
    %c0_i32_0 = arith.constant 0 : i32
    return %c0_i32, %arg0 : i32, i32
  }
}

</mosaic_0001>

<bundles_post_ra>
// kernel: positional_encoding_forward.1
= control target key start
LH: loop header
LB: loop body
LE: loop exit
PB: predicated region body
PF: predicated region fallthrough
CT: control target
= control target key end

     0   :  { %vm15_vm0 = vcmask 1041408   ;;  %s48_s0 = inlined_call_operand.vmem [shape: f32[4,128], index: 0, kind: input, shape index: {}, may-alias: {0,2}]   ;;  %s49_s1 = inlined_call_operand.vmem [shape: f32[2,128], index: 1, kind: input, shape index: {}]   ;;  %s50_s2 = inlined_call_operand.vmem [shape: f32[4,128], index: 2, kind: output, shape index: {}, may-alias: {0,2}]  }
   0x1   :  { %v11_v0 = vld [vmem:[%s49_s1] sm:$0x3] }
   0x2   :  { %v13_v1 = vrot.slane %v11_v0, 6  ;;  %v17_v2 = vld [vmem:[%s48_s0] sm:$0xf] }
   0x4   :  { %v16_v3 = vsel %vm15_vm0, %v11_v0, %v13_v1 }
   0x5   :  { %v18_v4 = vadd.f32 %v17_v2, %v16_v3 }
   0x7   :  { %19 = vst [vmem:[%s50_s2] sm:$0xf] %v18_v4 }

</bundles_post_ra>
